<compile_context>
chip_gen: v7x
topology: tpu7x:2x2x1
jax: 0.10.0
libtpu: 0.0.40
codegen_flags: <defaults>
</compile_context>

<pallas_src>
import jax
import jax.numpy as jnp
from jax.experimental import pallas as pl
from jax.experimental.pallas import tpu as pltpu

_LANE = 128
_SUBLANE = 8
_HIDDEN = 64


def _round_up(x, m):
    return ((x + m - 1) // m) * m


def _critic_kernel(x_ref, w1_ref, b1_ref, w2_ref, b2_ref, w3_ref, b3_ref, o_ref):
    # One batch tile per grid step; all three matmuls + ReLUs fused.
    # x arrives as raw f32 (no wrapper pad/cast pass); the cast to the MXU
    # operand dtype rides in VPU slack of this HBM-bound kernel.
    x = x_ref[...].astype(w1_ref.dtype)
    h1 = jnp.dot(x, w1_ref[...], preferred_element_type=jnp.float32) + b1_ref[...]
    h1 = jnp.maximum(h1, 0.0)
    h2 = jnp.dot(h1.astype(w2_ref.dtype), w2_ref[...],
                 preferred_element_type=jnp.float32) + b2_ref[...]
    h2 = jnp.maximum(h2, 0.0)
    out = jnp.dot(h2.astype(w3_ref.dtype), w3_ref[...],
                  preferred_element_type=jnp.float32) + b3_ref[...]
    o_ref[...] = out.astype(o_ref.dtype)


def prepare_critic_params(params, compute_dtype=jnp.bfloat16):
    """One-time parameter prep, hoisted out of the per-call path.

    Casts weights to the MXU operand dtype (bf16 default; f32 for exactness)
    and reshapes biases to (1, out) f32 so the kernel adds them in f32.
    """
    cdt = jnp.dtype(compute_dtype)
    return {
        "w1": jnp.asarray(params["w1"], cdt),
        "w2": jnp.asarray(params["w2"], cdt),
        "w3": jnp.asarray(params["w3"], cdt),
        "b1": jnp.asarray(params["b1"], jnp.float32).reshape(1, -1),
        "b2": jnp.asarray(params["b2"], jnp.float32).reshape(1, -1),
        "b3": jnp.asarray(params["b3"], jnp.float32).reshape(1, -1),
    }


def critic_forward(x, prepared, *, block_batch=4096):
    """x: (batch, input_dim) f32.  prepared: output of prepare_critic_params."""
    w1, b1 = prepared["w1"], prepared["b1"]
    w2, b2 = prepared["w2"], prepared["b2"]
    w3, b3 = prepared["w3"], prepared["b3"]

    batch, input_dim = x.shape
    hidden = w1.shape[1]
    action_dim = w3.shape[1]
    cdt = jnp.dtype(w1.dtype)

    # ---- VMEM-padded footprints (what tiles actually occupy in VMEM) ----
    k_vmem = _round_up(input_dim, _LANE)           # x tile lanes (f32)
    a_vmem = _round_up(action_dim, _LANE)          # out tile lanes (f32)
    sub = max(32 // cdt.itemsize, _SUBLANE)        # sublane packing of compute dtype
    w_bytes = (_round_up(input_dim, sub) * _round_up(hidden, _LANE)
               + _round_up(hidden, sub) * _round_up(hidden, _LANE)
               + _round_up(hidden, sub) * _round_up(action_dim, _LANE)) * cdt.itemsize
    b_bytes = 3 * _SUBLANE * _LANE * 4

    # Per-TensorCore VMEM capacity; cap well below physical (v7x has only 64 MiB).
    try:
        phys_vmem = int(pltpu.get_tpu_info().vmem_capacity_bytes)
    except Exception:
        phys_vmem = 64 * 1024 * 1024               # v7x per-TC: smallest generation
    vmem_cap = (phys_vmem * 3) // 4                # headroom for compiler scratch

    # Largest batch tile whose double-buffered in/out tiles + resident weights
    # fit under the cap with 2x headroom.
    per_row_vmem = (k_vmem + a_vmem) * 4           # f32 x tile + f32 out tile per row
    max_tb = (vmem_cap // 2 - 2 * (w_bytes + b_bytes)) // (2 * per_row_vmem)
    max_tb = max((max_tb // _SUBLANE) * _SUBLANE, _SUBLANE)

    # ---- batch tiling (ragged last block handled by Pallas masked writeback) ----
    if batch <= _SUBLANE:
        tb = batch                                  # block == full dim: always legal
    else:
        tb = min(_round_up(block_batch, _SUBLANE),
                 (batch // _SUBLANE) * _SUBLANE,
                 max_tb)
    grid = (pl.cdiv(batch, tb),)

    vmem_needed = 2 * tb * per_row_vmem + 2 * (w_bytes + b_bytes)
    vmem_limit = int(min(max(2 * vmem_needed, 32 * 1024 * 1024), vmem_cap))

    # Advisory cost estimate (real bytes only: x read, out write, weights once).
    flops = 2 * batch * (input_dim * hidden + hidden * hidden + hidden * action_dim)
    bytes_accessed = (batch * input_dim * x.dtype.itemsize
                      + batch * action_dim * 4
                      + (input_dim * hidden + hidden * hidden
                         + hidden * action_dim) * cdt.itemsize
                      + (2 * hidden + action_dim) * 4)

    return pl.pallas_call(
        _critic_kernel,
        out_shape=jax.ShapeDtypeStruct((batch, action_dim), jnp.float32),
        grid_spec=pltpu.PrefetchScalarGridSpec(
            num_scalar_prefetch=0,
            grid=grid,
            in_specs=[
                pl.BlockSpec((tb, input_dim), lambda i: (i, 0)),       # x: streamed raw f32
                pl.BlockSpec((input_dim, hidden), lambda i: (0, 0)),   # w1: resident
                pl.BlockSpec((1, hidden), lambda i: (0, 0)),           # b1: resident
                pl.BlockSpec((hidden, hidden), lambda i: (0, 0)),      # w2: resident
                pl.BlockSpec((1, hidden), lambda i: (0, 0)),           # b2: resident
                pl.BlockSpec((hidden, action_dim), lambda i: (0, 0)),  # w3: resident
                pl.BlockSpec((1, action_dim), lambda i: (0, 0)),       # b3: resident
            ],
            out_specs=pl.BlockSpec((tb, action_dim), lambda i: (i, 0)),
        ),
        compiler_params=pltpu.CompilerParams(
            dimension_semantics=("parallel",),   # v7x: shard batch tiles over 2 TCs
            vmem_limit_bytes=vmem_limit,
        ),
        cost_estimate=pl.CostEstimate(
            flops=flops, transcendentals=0, bytes_accessed=bytes_accessed),
    )(x, w1, b1, w2, b2, w3, b3)


def init_critic_params(key, agent_num, state_dim, action_dim):
    """Deterministic init mimicking PyTorch nn.Linear default (U(-1/sqrt(fan_in), +))."""
    input_dim = 1 + state_dim * agent_num + agent_num
    dims = [(input_dim, _HIDDEN), (_HIDDEN, _HIDDEN), (_HIDDEN, action_dim)]
    params = {}
    keys = jax.random.split(key, 6)
    for i, (fan_in, fan_out) in enumerate(dims, start=1):
        bound = 1.0 / jnp.sqrt(jnp.float32(fan_in))
        params[f"w{i}"] = jax.random.uniform(
            keys[2 * (i - 1)], (fan_in, fan_out), jnp.float32, -bound, bound)
        params[f"b{i}"] = jax.random.uniform(
            keys[2 * (i - 1) + 1], (fan_out,), jnp.float32, -bound, bound)
    return params, input_dim


if __name__ == "__main__":
    # Small, deterministic example consistent with the module's __init__.
    agent_num = 3
    state_dim = 10
    action_dim = 5
    batch = 20   # deliberately not a tile multiple -> exercises the ragged last block

    key = jax.random.PRNGKey(0)
    pkey, xkey = jax.random.split(key)
    params, input_dim = init_critic_params(pkey, agent_num, state_dim, action_dim)
    x = jax.random.normal(xkey, (batch, input_dim), dtype=jnp.float32)

    # Pure-JAX f32 reference (the PyTorch module's math).
    h1 = jnp.maximum(x @ params["w1"] + params["b1"], 0.0)
    h2 = jnp.maximum(h1 @ params["w2"] + params["b2"], 0.0)
    ref = h2 @ params["w3"] + params["b3"]

    # Exact path: f32 MXU operands; small tiles to exercise a multi-step grid
    # plus the ragged final block (20 rows, 8-row tiles -> 3 grid steps).
    p_f32 = prepare_critic_params(params, compute_dtype=jnp.float32)
    out_f32 = jax.block_until_ready(critic_forward(x, p_f32, block_batch=8))
    assert out_f32.shape == (batch, action_dim)
    assert jnp.allclose(out_f32, ref, atol=1e-5, rtol=1e-5)

    # Default fast path: bf16 MXU operands, f32 accumulation / bias / ReLU.
    p_bf16 = prepare_critic_params(params)
    out_bf16 = jax.block_until_ready(critic_forward(x, p_bf16))
    assert out_bf16.shape == (batch, action_dim)
    assert jnp.allclose(out_bf16, ref, atol=5e-2, rtol=5e-2)

    print("KERNEL_OK")
</pallas_src>

<mosaic_0001>
module attributes {stable_mosaic.version = 11 : i64} {
  func.func @_critic_kernel(%arg0: i32, %arg1: memref<8x34xf32, #tpu.memory_space<vmem>>, %arg2: memref<34x64xf32, #tpu.memory_space<vmem>>, %arg3: memref<1x64xf32, #tpu.memory_space<vmem>>, %arg4: memref<64x64xf32, #tpu.memory_space<vmem>>, %arg5: memref<1x64xf32, #tpu.memory_space<vmem>>, %arg6: memref<64x5xf32, #tpu.memory_space<vmem>>, %arg7: memref<1x5xf32, #tpu.memory_space<vmem>>, %arg8: memref<8x5xf32, #tpu.memory_space<vmem>>) attributes {dimension_semantics = [#tpu.dimension_semantics<parallel>], iteration_bounds = array<i64: 3>, scalar_prefetch = 0 : i64, scratch_operands = 0 : i64, tpu.core_type = #tpu.core_type<tc>, window_params = [{transform_indices = @transform_0, window_bounds = array<i64: 8, 34>}, {pipeline_mode = #tpu.pipeline_mode<synchronous>, transform_indices = @transform_1, window_bounds = array<i64: 34, 64>}, {pipeline_mode = #tpu.pipeline_mode<synchronous>, transform_indices = @transform_2, window_bounds = array<i64: 1, 64>}, {pipeline_mode = #tpu.pipeline_mode<synchronous>, transform_indices = @transform_3, window_bounds = array<i64: 64, 64>}, {pipeline_mode = #tpu.pipeline_mode<synchronous>, transform_indices = @transform_4, window_bounds = array<i64: 1, 64>}, {pipeline_mode = #tpu.pipeline_mode<synchronous>, transform_indices = @transform_5, window_bounds = array<i64: 64, 5>}, {pipeline_mode = #tpu.pipeline_mode<synchronous>, transform_indices = @transform_6, window_bounds = array<i64: 1, 5>}, {transform_indices = @transform_7, window_bounds = array<i64: 8, 5>}]} {
    %c0 = arith.constant 0 : index
    %c0_0 = arith.constant 0 : index
    %0 = vector.load %arg1[%c0, %c0_0] : memref<8x34xf32, #tpu.memory_space<vmem>>, vector<8x34xf32>
    %c0_1 = arith.constant 0 : index
    %c0_2 = arith.constant 0 : index
    %1 = vector.load %arg2[%c0_1, %c0_2] : memref<34x64xf32, #tpu.memory_space<vmem>>, vector<34x64xf32>
    %cst = arith.constant dense<0.000000e+00> : vector<8x64xf32>
    %2 = tpu.matmul %0, %1, %cst {dimension_numbers = #tpu.dot_dimension_numbers<[1], [0], [0], [1], [0, 0, 1, 1], [], []>} : vector<8x34xf32>, vector<34x64xf32>, vector<8x64xf32> -> vector<8x64xf32>
    %c0_3 = arith.constant 0 : index
    %c0_4 = arith.constant 0 : index
    %3 = vector.load %arg3[%c0_3, %c0_4] : memref<1x64xf32, #tpu.memory_space<vmem>>, vector<1x64xf32>
    %4 = vector.broadcast %3 : vector<1x64xf32> to vector<8x64xf32>
    %5 = arith.addf %2, %4 : vector<8x64xf32>
    %cst_5 = arith.constant 0.000000e+00 : f32
    %6 = vector.broadcast %cst_5 : f32 to vector<8x64xf32>
    %7 = arith.maximumf %5, %6 : vector<8x64xf32>
    %c0_6 = arith.constant 0 : index
    %c0_7 = arith.constant 0 : index
    %8 = vector.load %arg4[%c0_6, %c0_7] : memref<64x64xf32, #tpu.memory_space<vmem>>, vector<64x64xf32>
    %cst_8 = arith.constant dense<0.000000e+00> : vector<8x64xf32>
    %9 = tpu.matmul %7, %8, %cst_8 {dimension_numbers = #tpu.dot_dimension_numbers<[1], [0], [0], [1], [0, 0, 1, 1], [], []>} : vector<8x64xf32>, vector<64x64xf32>, vector<8x64xf32> -> vector<8x64xf32>
    %c0_9 = arith.constant 0 : index
    %c0_10 = arith.constant 0 : index
    %10 = vector.load %arg5[%c0_9, %c0_10] : memref<1x64xf32, #tpu.memory_space<vmem>>, vector<1x64xf32>
    %11 = vector.broadcast %10 : vector<1x64xf32> to vector<8x64xf32>
    %12 = arith.addf %9, %11 : vector<8x64xf32>
    %cst_11 = arith.constant 0.000000e+00 : f32
    %13 = vector.broadcast %cst_11 : f32 to vector<8x64xf32>
    %14 = arith.maximumf %12, %13 : vector<8x64xf32>
    %c0_12 = arith.constant 0 : index
    %c0_13 = arith.constant 0 : index
    %15 = vector.load %arg6[%c0_12, %c0_13] : memref<64x5xf32, #tpu.memory_space<vmem>>, vector<64x5xf32>
    %cst_14 = arith.constant dense<0.000000e+00> : vector<8x5xf32>
    %16 = tpu.matmul %14, %15, %cst_14 {dimension_numbers = #tpu.dot_dimension_numbers<[1], [0], [0], [1], [0, 0, 1, 1], [], []>} : vector<8x64xf32>, vector<64x5xf32>, vector<8x5xf32> -> vector<8x5xf32>
    %c0_15 = arith.constant 0 : index
    %c0_16 = arith.constant 0 : index
    %17 = vector.load %arg7[%c0_15, %c0_16] : memref<1x5xf32, #tpu.memory_space<vmem>>, vector<1x5xf32>
    %18 = vector.broadcast %17 : vector<1x5xf32> to vector<8x5xf32>
    %19 = arith.addf %16, %18 : vector<8x5xf32>
    %c0_17 = arith.constant 0 : index
    %c0_18 = arith.constant 0 : index
    %20 = vector.load %arg8[%c0_17, %c0_18] : memref<8x5xf32, #tpu.memory_space<vmem>>, vector<8x5xf32>
    tpu.vector_store %arg8[%c0_17, %c0_18], %19 {strides = array<i32>} : memref<8x5xf32, #tpu.memory_space<vmem>>, vector<8x5xf32>,
    return
  }
  func.func @transform_0(%arg0: i32) -> (i32, i32) {
    %c0_i32 = arith.constant 0 : i32
    %c0_i32_0 = arith.constant 0 : i32
    return %arg0, %c0_i32 : i32, i32
  }
  func.func @transform_1(%arg0: i32) -> (i32, i32) {
    %c0_i32 = arith.constant 0 : i32
    %c0_i32_0 = arith.constant 0 : i32
    %c0_i32_1 = arith.constant 0 : i32
    return %c0_i32, %c0_i32_0 : i32, i32
  }
  func.func @transform_2(%arg0: i32) -> (i32, i32) {
    %c0_i32 = arith.constant 0 : i32
    %c0_i32_0 = arith.constant 0 : i32
    %c0_i32_1 = arith.constant 0 : i32
    return %c0_i32, %c0_i32_0 : i32, i32
  }
  func.func @transform_3(%arg0: i32) -> (i32, i32) {
    %c0_i32 = arith.constant 0 : i32
    %c0_i32_0 = arith.constant 0 : i32
    %c0_i32_1 = arith.constant 0 : i32
    return %c0_i32, %c0_i32_0 : i32, i32
  }
  func.func @transform_4(%arg0: i32) -> (i32, i32) {
    %c0_i32 = arith.constant 0 : i32
    %c0_i32_0 = arith.constant 0 : i32
    %c0_i32_1 = arith.constant 0 : i32
    return %c0_i32, %c0_i32_0 : i32, i32
  }
  func.func @transform_5(%arg0: i32) -> (i32, i32) {
    %c0_i32 = arith.constant 0 : i32
    %c0_i32_0 = arith.constant 0 : i32
    %c0_i32_1 = arith.constant 0 : i32
    return %c0_i32, %c0_i32_0 : i32, i32
  }
  func.func @transform_6(%arg0: i32) -> (i32, i32) {
    %c0_i32 = arith.constant 0 : i32
    %c0_i32_0 = arith.constant 0 : i32
    %c0_i32_1 = arith.constant 0 : i32
    return %c0_i32, %c0_i32_0 : i32, i32
  }
  func.func @transform_7(%arg0: i32) -> (i32, i32) {
    %c0_i32 = arith.constant 0 : i32
    %c0_i32_0 = arith.constant 0 : i32
    return %arg0, %c0_i32 : i32, i32
  }
}

</mosaic_0001>

<bundles_post_ra>
// kernel: tpu_custom_call.1
= control target key start
LH: loop header
LB: loop body
LE: loop exit
PB: predicated region body
PF: predicated region fallthrough
CT: control target
= control target key end

     0   :  { %12 = vsyncpa [#allocation3], 0  ;;  %s1184_s0 = inlined_call_operand.hbm [shape: f32[20,34], index: 0, kind: input, shape index: {}]   ;;  %s1185_s1 = inlined_call_operand.hbm [shape: f32[34,64], index: 1, kind: input, shape index: {}]   ;;  %s1186_s2 = inlined_call_operand.vmem [shape: f32[1,64], index: 2, kind: input, shape index: {}]   ;;  %s1187_s3 = inlined_call_operand.vmem [shape: f32[64,64], index: 3, kind: input, shape index: {}]   ;;  %s1188_s4 = inlined_call_operand.vmem [shape: f32[1,64], index: 4, kind: input, shape index: {}]   ;;  %s1189_s5 = inlined_call_operand.vmem [shape: f32[64,5], index: 5, kind: input, shape index: {}]   ;;  %s1190_s6 = inlined_call_operand.vmem [shape: f32[1,5], index: 6, kind: input, shape index: {}]   ;;  %s1191_s7 = inlined_call_operand.vmem [shape: f32[20,5], index: 7, kind: output, shape index: {}]  }
   0x1   :  { %14 = vsyncpa [#allocation3 + $0x1], 0 }
   0x2   :  { %15 = vsyncpa [#allocation5], 0  ;;  %s980_s24 = smov 0   ;;  %s982_s25 = smov 0  }
   0x3   :  { %s984_s26 = smov 0   ;;  %s986_s27 = smov 0  }
   0x4 LB: > { %s999_s28 = sadd.s32 4294967295, %s931_s27   ;;  %p41_p0 = scmp.ne.s32.totalorder %s923_s25, %s919_s24  ;;  %s931_s27 = sphi %s986_s27, %s1206_s27   ;;  %s927_s26 = sphi %s984_s26, %s1205_s26   ;;  %s923_s25 = sphi %s982_s25, %s1204_s25   ;;  %s919_s24 = sphi %s980_s24, %s1203_s24  }
   0x5   : > { %p1192_p1 = scmp.eq.s32.totalorder %s999_s28, 0  ;;  %p657_p2 = scmp.ge.s32.totalorder %s931_s27, 1 }
   0x6   : > { %p204_p3 = scmp.lt.s32.totalorder %s931_s27, 4  ;;  %s933_s8 = smov [#allocation4]  }
   0x7   : > { %p1007_p4 = por %p1192_p1, %p41_p0  ;;  %s216_s9 = sshll.u32 %s933_s8, 4  ;;  %s217_s9 = int_to_ptr.vmem [resolvable:$true] %s216_s9 }
   0x8   : > { %p1011_p5 = pnand %p657_p2, %p204_p3  ;;  %s1024_s11 = sadd.s32 1, %s931_s27  }
   0x9   : > { %s1195_s29 = scalar_select %p1007_p4, 1, 0 }
   0xa   : > { %s1196_s30 = scalar_select %p1011_p5, 1, 0 }
   0xb   : > { %p786_p6 = pneg %p1011_p5  ;;  %s28_s12 = sadd.s32 1, %s927_s26 }
   0xc   : > { %s25_s13 = ssub.s32 %s931_s27, %s1024_s11  ;;  %s835_s16 = scalar_lea.hbm %s1185_s1, 640 }
   0xd   : > { %p1019_p7 = pnand %p786_p6, %p1192_p1  ;;  %p836_p8 = scmp.ne.s32.totalorder %s1185_s1, %s835_s16 }
   0xe   : > { %p842_p12 = scmp.lt.u32.totalorder %s835_s16, %s1185_s1 }
   0xf   : > { %p837_p9 = pneg %p1019_p7 }
  0x11   : > { %p838_p10 = pnand %p837_p9, %p836_p8 }
  0x13   : > { %p839_p11 = pneg %p838_p10 }
  0x15   : > { %p844_p13 = pnand %p842_p12, %p839_p11 }
  0x17   : > { %847 = shalt.err (!%p844_p13)
}
  0x18   : > { %s848_s21 = scalar_lea.vmem %s217_s9, 640  ;;  %p856_p6 = scmp.lt.s32.totalorder %s217_s9, %s217_s9 }
  0x19   : > { %p849_p0 = scmp.ne.s32.totalorder %s217_s9, %s848_s21  ;;  %p857_p1 = scmp.lt.s32.totalorder %s848_s21, %s848_s21 }
  0x1b   : > { %p851_p2 = pnand %p849_p0, %p837_p9  ;;  %p858_p4 = por %p857_p1, %p856_p6 }
  0x1d   : > { %p852_p3 = pneg %p851_p2 }
  0x1f   : > { %p859_p5 = pnand %p858_p4, %p852_p3 }
  0x21   : > { %862 = shalt.err (!%p859_p5)
}
  0x22   : > { %s934_s22 = smov 128   ;;  %s935_s23 = smov 8  }
  0x23   : > { %789 = dma.hbm_to_vmem [thread:$0]  (!%p1019_p7), %s1185_s1, 640, %s217_s9, [#allocation5], %s934_s22, %s934_s22, %s935_s23  }
  0x24   : > { %p26_p8 = scmp.eq.s32.totalorder %s25_s13, 0  ;;  %p35_p9 = scmp.ne.s32.totalorder %s927_s26, %s923_s25 }
  0x25   : > { %p36_p1 = scmp.eq.s32.totalorder %s931_s27, 0  ;;  %p795_p4 = scmp.lt.s32.totalorder %s931_s27, 3 }
  0x26   : > { %s1050_s14 = scalar_select %p26_p8, %s927_s26, %s28_s12  }
  0x27   : > { %p37_p5 = por %p36_p1, %p35_p9  ;;  %s245_s15 = sand.u32 1, %s927_s26  }
  0x28   : > { %s660_s16 = sshll.u32 %s245_s15, 3  ;;  %s661_s17 = sshll.u32 %s931_s27, 7 }
  0x29   : > { %s1057_s20 = scalar_lea.hbm %s1184_s0, %s661_s17  ;;  %s249_s9 = scalar_lea.vmem [#allocation2], %s660_s16 }
  0x2a   : > { %s256_s10 = sshll.u32 %s249_s9, 4  ;;  %p1061_p7 = pnand %p795_p4, %p37_p5  ;;  %s1059_s10 = int_to_ptr.vmem [resolvable:$true] %s256_s10 }
  0x2b   : > { %s246_s27 = scalar_lea.sflag [#allocation3], %s245_s15  ;;  %s863_s13 = scalar_lea.hbm %s1057_s20, 128 }
  0x2c   : > { %p864_p10 = scmp.ne.s32.totalorder %s1057_s20, %s863_s13  ;;  %p865_p11 = pneg %p1061_p7 }
  0x2d   : > { %s868_s23 = scalar_lea.hbm %s1184_s0, 384  ;;  %p869_p0 = scmp.lt.u32.totalorder %s1057_s20, %s1184_s0 }
  0x2e   : > { %p866_p12 = pnand %p865_p11, %p864_p10  ;;  %p870_p2 = scmp.lt.u32.totalorder %s868_s23, %s863_s13 }
  0x2f   : > { %p872_p6 = scmp.lt.u32.totalorder %s863_s13, %s1057_s20 }
  0x30   : > { %p867_p13 = pneg %p866_p12  ;;  %p871_p3 = por %p870_p2, %p869_p0 }
  0x32   : > { %p873_p8 = por %p872_p6, %p871_p3 }
  0x34   : > { %p874_p9 = pnand %p873_p8, %p867_p13 }
  0x36   : > { %877 = shalt.err (!%p874_p9)
}
  0x37   : > { %s878_s15 = scalar_lea.vmem %s1059_s10, 128  ;;  %s936_s16 = smov [#allocation2]  }
  0x38   : > { %p879_p1 = scmp.ne.s32.totalorder %s1059_s10, %s878_s15  ;;  %s883_s17 = sshll.u32 %s936_s16, 4  ;;  %s884_s17 = int_to_ptr.vmem [resolvable:$false] %s883_s17 }
  0x39   : > { %s885_s18 = scalar_lea.vmem %s884_s17, 256  ;;  %p886_p10 = scmp.lt.s32.totalorder %s1059_s10, %s884_s17 }
  0x3a   : > { %p881_p4 = pnand %p879_p1, %p865_p11  ;;  %p887_p12 = scmp.lt.s32.totalorder %s885_s18, %s878_s15 }
  0x3c   : > { %p882_p5 = pneg %p881_p4  ;;  %p888_p0 = por %p887_p12, %p886_p10 }
  0x3e   : > { %p889_p2 = pnand %p888_p0, %p882_p5 }
  0x40   : > { %892 = shalt.err (!%p889_p2)
}
  0x41   : > { %793 = dma.hbm_to_vmem [thread:$0]  (!%p1061_p7), %s1057_s20, 128, %s1059_s10, %s246_s27  }
  0x42   : > { %p1199_p13 = scmp.ne.s32.totalorder %s1196_s30, 0 }
  0x43   : > { %s267_s19 = sand.u32 (!%p1199_p13), 1, %s923_s25   ;;  %p1200_p11 = scmp.ne.s32.totalorder (!%p1199_p13), %s1195_s29, 0 }
  0x44   : > { %265 = sbr.rel (%p1199_p13) target bundleno = 738 (0x2e2), region = 48  ;;  %s1093_s9 = sshll.u32 (!%p1199_p13), %s267_s19, 3 }
  0x45   : > { %s268_s13 = scalar_lea.sflag (!%p1199_p13), [#allocation3], %s267_s19  ;;  %s271_s21 = scalar_lea.vmem (!%p1199_p13), [#allocation2], %s1093_s9 }
  0x4b   : > { %910 = dma.done.wait (%p1200_p11), %s268_s13, 128  }
  0x4c   : > { %912 = vsyncadd (%p1200_p11), %s268_s13, 4294967168  ;;  %p1201_p3 = scmp.eq.s32.totalorder %s999_s28, 0 }
  0x4e   : > { %914 = dma.done.wait (%p1201_p3), [#allocation5], 640   ;;  %p1202_p7 = pmov %p1201_p3 }
  0x4f   : > { %v937_v0 = vmov 0.0|0.0   ;;  %vm938_vm0 = vmmov 0   ;;  %v939_v1 = vmov 0.0   ;;  %v310_v2 = vld [vmem:[#allocation4] sm:$0xff]  ;;  %v311_v3 = vld [vmem:[#allocation4 + $0x8] sm:$0xff]  ;;  %v312_v4 = vld [vmem:[#allocation4 + $0x10] sm:$0xff] }
  0x50   : > { %916 = vsyncadd (%p1202_p7), [#allocation5], 4294966656  ;;  %750 = vmatprep.subr.bf16.mxu0 %v937_v0  ;;  %709 = vmatprep.mubr.msk.f32.mxu0 %vm938_vm0, %v939_v1  ;;  %v751_v5 = vpack.c.bf16 %v311_v3, %v310_v2  ;;  %v313_v6 = vld [vmem:[#allocation4 + $0x18] sm:$0xff]  ;;  %v401_v7 = vld [vmem:[%s1187_s3] sm:$0xff]  ;;  %vm326_vm1 = vcmask 1041408   ;;  %vm322_vm2 = vcmask 277504  }
  0x51   : > { %756 = vmatprep.subr.bf16.mxu1 %v937_v0  ;;  %728 = vmatprep.mubr.msk.f32.mxu1 %vm938_vm0, %v939_v1  ;;  %v402_v8 = vld [vmem:[%s1187_s3 + $0x8] sm:$0xff]  ;;  %v403_v9 = vld [vmem:[%s1187_s3 + $0x10] sm:$0xff]  ;;  %v754_v10 = vpack.c.bf16 %v313_v6, %v312_v4  ;;  %v404_v12 = vld [vmem:[%s1187_s3 + $0x18] sm:$0xff]  ;;  %vm416_vm3 = vcmask 523264   ;;  %p305_p6 = scmp.lt.s32.totalorder %s999_s28, 2  ;;  %vm579_vm4 = vcmask 39936  }
  0x52   : > { %752 = vmatpush3.bf16.msra.mxu0 %v751_v5  ;;  %v757_v11 = vpack.c.bf16 %v402_v8, %v401_v7  ;;  %v760_v13 = vpack.c.bf16 %v404_v12, %v403_v9  ;;  %v405_v14 = vld [vmem:[%s1187_s3 + $0x20] sm:$0xff]  ;;  %v406_v15 = vld [vmem:[%s1187_s3 + $0x28] sm:$0xff]  ;;  %v314_v16 = vld [vmem:[#allocation4 + $0x20] sm:$0x3] }
  0x53   : > { %753 = vmatprep.subr.bf16.mxu0 %v937_v0  ;;  %v309_v17 = vld [vmem:[%s271_s21] sm:$0xff]  ;;  %v763_v18 = vpack.c.bf16 %v406_v15, %v405_v14  ;;  %v407_v19 = vld [vmem:[%s1187_s3 + $0x30] sm:$0xff]  ;;  %v408_v20 = vld [vmem:[%s1187_s3 + $0x38] sm:$0xff]  ;;  %s1208_s28 = smov (!%p305_p6, %s999_s28), 2 }
  0x54   : > { %758 = vmatpush3.bf16.msra.mxu1 %v757_v11  ;;  %v766_v21 = vpack.c.bf16 %v408_v20, %v407_v19  ;;  %v491_v22 = vld [vmem:[%s1189_s5] sm:$0xff]  ;;  %v492_v23 = vld [vmem:[%s1189_s5 + $0x8] sm:$0xff]  ;;  %v493_v24 = vld [vmem:[%s1189_s5 + $0x10] sm:$0xff]  ;;  %s665_s29 = sshll.u32 %s1208_s28, 3 }
  0x55   : > { %759 = vmatprep.subr.bf16.mxu1 %v937_v0  ;;  %v769_v25 = vpack.c.bf16 %v492_v23, %v491_v22  ;;  %v494_v26 = vld [vmem:[%s1189_s5 + $0x18] sm:$0xff]  ;;  %v495_v28 = vld [vmem:[%s1189_s5 + $0x20] sm:$0xff]  ;;  %v496_v29 = vld [vmem:[%s1189_s5 + $0x28] sm:$0xff]  ;;  %s308_s27 = scalar_lea.vmem %s1191_s7, %s665_s29 }
  0x56   : > { %755 = vmatpush3.bf16.msra.mxu0 %v754_v10  ;;  %v772_v27 = vpack.c.bf16 %v494_v26, %v493_v24  ;;  %v775_v30 = vpack.c.bf16 %v496_v29, %v495_v28  ;;  %v666_v31 = vld [vmem:[%s1186_s2] ss:$0 sm:$0xff]  ;;  %v497_v36 = vld [vmem:[%s1189_s5 + $0x30] sm:$0xff]  ;;  %v498_v37 = vld [vmem:[%s1189_s5 + $0x38] sm:$0xff] }
  0x57   : > { %707 = vmatprep.subr.mxu0 %v939_v1  ;;  %v778_v38 = vpack.c.bf16 %v498_v37, %v497_v36  ;;  %v669_v39 = vld [vmem:[%s1188_s4] ss:$0 sm:$0xff] }
  0x58   : > { %761 = vmatpush3.bf16.msra.mxu1 %v760_v13  ;;  %v671_v44 = vld [vmem:[%s1190_s6] ss:$0 sm:$0xff] }
  0x59   : > { %762 = vmatprep.subr.bf16.mxu1 %v937_v0 }
  0x5a   : > { %708 = vmatpush3.msk.msra.mxu0 %vm326_vm1, %v314_v16 }
  0x5b   : > { %710 = vmatmul.mubr.msk.f32.vlgmr.msra.gmra.mrb[0].mxu0 %vm322_vm2, %v309_v17  ;;  %768 = vmatprep.subr.bf16.mxu0 %v937_v0 }
  0x5c   : > { %764 = vmatpush3.bf16.msra.mxu1 %v763_v18  ;;  %747 = vmatprep.mubr.msk.f32.mxu0 %vm938_vm0, %v939_v1 }
  0x5d   : > { %765 = vmatprep.subr.bf16.mxu1 %v937_v0  ;;  %770 = vmatpush3.bf16.msra.mxu0 %v769_v25 }
  0x5e   : > { %771 = vmatprep.subr.bf16.mxu0 %v937_v0 }
  0x60   : > { %767 = vmatpush3.bf16.msra.mxu1 %v766_v21 }
  0x61   : > { %773 = vmatpush3.bf16.msra.mxu0 %v772_v27 }
  0x62   : > { %774 = vmatprep.subr.bf16.mxu0 %v937_v0 }
  0x65   : > { %776 = vmatpush3.bf16.msra.mxu0 %v775_v30 }
  0x66   : > { %777 = vmatprep.subr.bf16.mxu0 %v937_v0 }
  0x69   : > { %779 = vmatpush3.bf16.msra.mxu0 %v778_v38 }
 0x12e   : > { %v396_v32 = vpop.f32.mrb[0].mxu0 }
 0x12f   : > { %v397_v33 = vadd.f32 %v666_v31, %v396_v32  ;;  %v711_v34 = vpop.f32.mrb[1].mxu0 }
 0x131   : > { %v400_v35 = vmax.f32 %v397_v33, 0.0 }
 0x133   : > { %729 = vmatmul.mubr.msk.f32.vlgmr.msra.gmra.mrb[0].mxu1 %vm416_vm3, %v400_v35 }
 0x206   : > { %v486_v40 = vpop.f32.mrb[0].mxu1 }
 0x207   : > { %v487_v41 = vadd.f32 %v669_v39, %v486_v40  ;;  %v730_v42 = vpop.f32.mrb[1].mxu1 }
 0x209   : > { %v490_v43 = vmax.f32 %v487_v41, 0.0 }
 0x20b   : > { %748 = vmatmul.mubr.msk.f32.vlgmr.msra.gmra.mrb[2].mxu0 %vm416_vm3, %v490_v43 }
 0x2de   : > { %v575_v45 = vpop.f32.mrb[2].mxu0 }
 0x2df   : > { %v576_v46 = vadd.f32 %v671_v44, %v575_v45  ;;  %v749_v47 = vpop.f32.mrb[3].mxu0 }
 0x2e1   : > { %580 = vst.msk [vmem:[%s308_s27] sm:$0xff] %vm579_vm4, %v576_v46 }
 0x2e2 PF: > { %p18_p8 = scmp.ge.s32.totalorder %s1024_s11, 5   ;;  %s1203_s24 = smov %s923_s25 }
 0x2e3   : > { %s1204_s25 = smov %s927_s26  ;;  %s1205_s26 = smov %s1050_s14 }
 0x2e4   : > { %s1206_s27 = smov %s1024_s11  ;;  %20 = sbr.rel (!%p18_p8) target bundleno = 4 (0x4), region = 92 }
 0x2eb   :  { %600 = vsyncpa [#allocation3], 1 }
 0x2ec   :  { %602 = vsyncpa [#allocation3 + $0x1], 1 }
 0x2ed   :  { %603 = vsyncpa [#allocation5], 1 }

</bundles_post_ra>
